<compile_context>
chip_gen: v5e
topology: v5e:2x2
jax: 0.10.0
libtpu: 0.0.40
codegen_flags: <defaults>
</compile_context>

<pallas_src>
import jax
import jax.numpy as jnp
from jax import lax
from jax.experimental import pallas as pl
from jax.experimental.pallas import tpu as pltpu

HIGHEST = lax.Precision.HIGHEST


def _pick_tile_p(P, pref):
    for t in (pref, 2048, 1024, 512, 256, 128):
        if t <= P and P % t == 0 and t % 128 == 0:
            return t
    return P


# ---------------------------------------------------------------------------
# Kernel 1: fused qkv 1x1 conv (channel-major MXU matmul) + depthwise 3x3 conv
# ---------------------------------------------------------------------------
def _make_qkv_dw_kernel(C3, W, P, padw):
    def kernel(x_ref, wq_ref, wdw_ref, o_ref, zpad_ref):
        # Zero the halo pads exactly once; the scratch buffer persists across
        # the batch grid and only its centre region is rewritten per image.
        @pl.when(pl.program_id(0) == 0)
        def _zero_pads():
            zpad_ref[:, :padw] = jnp.zeros((C3, padw), jnp.float32)
            zpad_ref[:, padw + P:] = jnp.zeros((C3, padw), jnp.float32)

        # 1x1 conv: (3C, C) @ (C, P) on the MXU (bf16 in, f32 accumulate).
        xb = x_ref[0].astype(jnp.bfloat16)                          # cast in-kernel
        z = lax.dot_general(
            wq_ref[...], xb, (((1,), (0,)), ((), ())),
            preferred_element_type=jnp.float32)                     # (3C, P) f32

        # Stage into the zero-padded VMEM buffer: each 3x3 tap becomes a plain
        # lane-shifted slice.  Vertical out-of-image taps land in the zero pads;
        # horizontal wrap across image rows is masked with column masks below.
        zpad_ref[:, padw:padw + P] = z
        zp = zpad_ref[...]                                          # (3C, P + 2*padw)

        col = lax.broadcasted_iota(jnp.int32, (1, P), 1) % W
        not_left = col != 0
        not_right = col != (W - 1)

        acc = jnp.zeros((C3, P), jnp.float32)
        for di in (-1, 0, 1):
            for dj in (-1, 0, 1):
                off = di * W + dj
                tap = (di + 1) * 3 + (dj + 1)
                s = zp[:, padw + off:padw + off + P]                # (3C, P)
                if dj == 1:
                    s = jnp.where(not_right, s, jnp.float32(0.0))
                elif dj == -1:
                    s = jnp.where(not_left, s, jnp.float32(0.0))
                acc = acc + wdw_ref[tap] * s                        # (3C,1) * (3C,P)
        o_ref[...] = acc.astype(o_ref.dtype)[None]                  # bf16 store
    return kernel


def fused_qkv_dwconv(x_bcp, w_qkv, w_dw, H, W):
    """x_bcp: (B, C, P) f32; w_qkv: (3C, C); w_dw: (3C, 3, 3) -> (B, 3C, P) bf16."""
    B, C, P = x_bcp.shape
    C3 = 3 * C
    padw = ((W + 1) + 127) // 128 * 128
    wq = jnp.asarray(w_qkv, jnp.float32).astype(jnp.bfloat16)                 # (3C, C)
    wdw9 = jnp.transpose(jnp.asarray(w_dw, jnp.float32).reshape(C3, 9))[:, :, None]  # (9,3C,1)
    # TODO(synk): halo-tile this kernel over image rows so the (3C, P) staging
    # buffer streams through VMEM at large Restormer resolutions / on v7x's 64 MiB VMEM.
    return pl.pallas_call(
        _make_qkv_dw_kernel(C3, W, P, padw),
        out_shape=jax.ShapeDtypeStruct((B, C3, P), jnp.bfloat16),
        grid_spec=pltpu.PrefetchScalarGridSpec(
            num_scalar_prefetch=0, grid=(B,),
            in_specs=[pl.BlockSpec((1, C, P), lambda b: (b, 0, 0)),
                      pl.BlockSpec((C3, C), lambda b: (0, 0)),
                      pl.BlockSpec((9, C3, 1), lambda b: (0, 0, 0))],
            out_specs=pl.BlockSpec((1, C3, P), lambda b: (b, 0, 0)),
            scratch_shapes=[pltpu.VMEM((C3, P + 2 * padw), jnp.float32)]),
        compiler_params=pltpu.CompilerParams(
            dimension_semantics=("parallel",)),
    )(x_bcp, wq, wdw9)


# ---------------------------------------------------------------------------
# Kernel 2: streamed transposed-attention scores.
#   Accumulate raw q@k^T (all heads at once) and per-channel sum-of-squares over
#   P tiles; finalize L2-normalisation * temperature + per-head softmax as a
#   block-diagonal (C, C) matrix on the last tile.
# ---------------------------------------------------------------------------
def _make_scores_kernel(C, d, num_heads, TP):
    def kernel(temp_ref, qk_ref, o_ref, s_acc, qsq, ksq):
        t = pl.program_id(1)

        @pl.when(t == 0)
        def _init():
            s_acc[...] = jnp.zeros_like(s_acc)
            qsq[...] = jnp.zeros_like(qsq)
            ksq[...] = jnp.zeros_like(ksq)

        qk = qk_ref[0]                                       # (2C, TP) bf16
        q = qk[:C]                                           # sublane-aligned slices
        k = qk[C:]
        qf = q.astype(jnp.float32)
        kf = k.astype(jnp.float32)
        qsq[...] += jnp.sum(qf * qf, axis=-1, keepdims=True)  # (C, 1) column layout
        ksq[...] += lax.dot_general(                           # (1, C) row layout
            jnp.ones((1, TP), jnp.float32), kf * kf,
            (((1,), (1,)), ((), ())),
            preferred_element_type=jnp.float32)
        s_acc[...] += lax.dot_general(                         # raw q @ k^T, all heads
            q, k, (((1,), (1,)), ((), ())),
            preferred_element_type=jnp.float32)                # (C, C)

        @pl.when(t == pl.num_programs(1) - 1)
        def _finalize():
            eps2 = jnp.float32(1e-24)        # F.normalize eps = 1e-12, squared
            rq = lax.rsqrt(jnp.maximum(qsq[...], eps2))        # (C, 1) = 1/||q||
            rk = lax.rsqrt(jnp.maximum(ksq[...], eps2))        # (1, C) = 1/||k||
            # per-row temperature (channels are head-major), read from SMEM scalars
            hid = lax.broadcasted_iota(jnp.int32, (C, 1), 0) // d
            temp_col = jnp.zeros((C, 1), jnp.float32)
            for h in range(num_heads):
                temp_col = jnp.where(hid == h, temp_ref[h], temp_col)
            s = s_acc[...] * rq * rk * temp_col                # normalized, scaled scores
            # per-head softmax over the k-channel axis == block-diagonal softmax
            rid = lax.broadcasted_iota(jnp.int32, (C, C), 0) // d
            cid = lax.broadcasted_iota(jnp.int32, (C, C), 1) // d
            s = jnp.where(rid == cid, s, jnp.float32(-1e30))
            s = s - jnp.max(s, axis=-1, keepdims=True)
            e = jnp.exp(s)
            p = e * pl.reciprocal(jnp.sum(e, axis=-1, keepdims=True), approx=True)
            o_ref[...] = p[None]                               # block-diagonal (C, C)
    return kernel


def attn_scores(qkv_dw, temperature, num_heads, tile_p):
    """qkv_dw: (B, 3C, P) bf16; temperature: (heads,) f32 -> (B, C, C) block-diag softmax."""
    B, C3, P = qkv_dw.shape
    C = C3 // 3
    d = C // num_heads
    TP = tile_p
    return pl.pallas_call(
        _make_scores_kernel(C, d, num_heads, TP),
        out_shape=jax.ShapeDtypeStruct((B, C, C), jnp.float32),
        grid_spec=pltpu.PrefetchScalarGridSpec(
            num_scalar_prefetch=0, grid=(B, P // TP),
            in_specs=[pl.BlockSpec(memory_space=pltpu.MemorySpace.SMEM),
                      pl.BlockSpec((1, 2 * C, TP), lambda b, t: (b, 0, t))],  # q|k rows
            out_specs=pl.BlockSpec((1, C, C), lambda b, t: (b, 0, 0)),
            scratch_shapes=[pltpu.VMEM((C, C), jnp.float32),
                            pltpu.VMEM((C, 1), jnp.float32),
                            pltpu.VMEM((1, C), jnp.float32)]),
        compiler_params=pltpu.CompilerParams(
            dimension_semantics=("parallel", "arbitrary")),
    )(temperature, qkv_dw)


# ---------------------------------------------------------------------------
# Kernel 3: (softmax @ v) fused with the project_out 1x1 conv, streamed over P.
# ---------------------------------------------------------------------------
def _apply_proj_kernel(p_ref, v_ref, wp_ref, o_ref):
    o_mid = lax.dot_general(                                  # per-head attn (block-diag p)
        p_ref[0].astype(jnp.bfloat16), v_ref[0],
        (((1,), (0,)), ((), ())),
        preferred_element_type=jnp.float32)                   # (C, TP)
    y = lax.dot_general(                                      # project_out 1x1 conv
        wp_ref[...], o_mid.astype(jnp.bfloat16),
        (((1,), (0,)), ((), ())),
        preferred_element_type=jnp.float32)                   # (C, TP)
    o_ref[...] = y[None]


def attn_apply_project(qkv_dw, p_bd, w_proj, tile_p):
    """qkv_dw: (B, 3C, P) bf16; p_bd: (B, C, C); w_proj: (C, C) -> (B, C, P) f32."""
    B, C3, P = qkv_dw.shape
    C = C3 // 3
    TP = tile_p
    wp = jnp.asarray(w_proj, jnp.float32).astype(jnp.bfloat16)
    return pl.pallas_call(
        _apply_proj_kernel,
        out_shape=jax.ShapeDtypeStruct((B, C, P), jnp.float32),
        grid_spec=pltpu.PrefetchScalarGridSpec(
            num_scalar_prefetch=0, grid=(B, P // TP),
            in_specs=[pl.BlockSpec((1, C, C), lambda b, t: (b, 0, 0)),
                      pl.BlockSpec((1, C, TP), lambda b, t: (b, 2, t)),   # v rows
                      pl.BlockSpec((C, C), lambda b, t: (0, 0))],
            out_specs=pl.BlockSpec((1, C, TP), lambda b, t: (b, 0, t))),
        compiler_params=pltpu.CompilerParams(
            dimension_semantics=("parallel", "parallel")),
    )(p_bd, qkv_dw, wp)


# ---------------------------------------------------------------------------
# Full forward (channel-major throughout; only free reshapes in the wrapper)
# ---------------------------------------------------------------------------
def attention_forward(x, w_qkv, w_dw, w_proj, temperature, num_heads, tile_p=512):
    """x: (B, C, H, W) NCHW, matching the PyTorch module."""
    B, C, H, W = x.shape
    P = H * W
    assert C % num_heads == 0
    assert C % 8 == 0, "channel count must be a multiple of 8 (f32 sublane tiling)"
    tp = _pick_tile_p(P, tile_p)

    x_cp = x.reshape(B, C, P)                                  # channel-major, free view
    qkv_dw = fused_qkv_dwconv(x_cp, w_qkv, w_dw, H, W)         # (B, 3C, P) bf16
    temp = jnp.asarray(temperature, jnp.float32).reshape(num_heads)
    p_bd = attn_scores(qkv_dw, temp, num_heads, tp)            # (B, C, C) f32
    y = attn_apply_project(qkv_dw, p_bd, w_proj, tp)           # (B, C, P) f32
    return y.reshape(B, C, H, W)


# ---------------------------------------------------------------------------
# Pure-JAX reference (f32, HIGHEST precision) for correctness check
# ---------------------------------------------------------------------------
def reference_forward(x, w_qkv, w_dw, w_proj, temperature, num_heads):
    B, C, H, W = x.shape
    qkv = jnp.einsum('bchw,oc->bohw', x, w_qkv, precision=HIGHEST)
    qkv = lax.conv_general_dilated(
        qkv, w_dw[:, None, :, :], (1, 1), ((1, 1), (1, 1)),
        dimension_numbers=('NCHW', 'OIHW', 'NCHW'),
        feature_group_count=3 * C, precision=HIGHEST)
    q, k, v = jnp.split(qkv, 3, axis=1)
    d = C // num_heads
    q = q.reshape(B, num_heads, d, H * W)
    k = k.reshape(B, num_heads, d, H * W)
    v = v.reshape(B, num_heads, d, H * W)
    qn = q / jnp.maximum(jnp.linalg.norm(q, axis=-1, keepdims=True), 1e-12)
    kn = k / jnp.maximum(jnp.linalg.norm(k, axis=-1, keepdims=True), 1e-12)
    score = jnp.einsum('bhdp,bhep->bhde', qn, kn, precision=HIGHEST)
    score = score * temperature[None]
    score = jax.nn.softmax(score, axis=-1)
    out = jnp.einsum('bhde,bhep->bhdp', score, v, precision=HIGHEST)
    out = out.reshape(B, C, H, W)
    return jnp.einsum('bchw,oc->bohw', out, w_proj, precision=HIGHEST)


if __name__ == "__main__":
    # Small, module-consistent shapes: batch=2, dim=8, heads=2, 16x16 spatial.
    B, dim, num_heads, H, W = 2, 8, 2, 16, 16

    key = jax.random.PRNGKey(0)
    k0, k1, k2, k3, k4 = jax.random.split(key, 5)

    x = jax.random.normal(k0, (B, dim, H, W), jnp.float32)
    # Conv2d(dim, 3*dim, 1, bias=False) weight -> (3*dim, dim)
    w_qkv = jax.random.normal(k1, (3 * dim, dim), jnp.float32) * 0.2
    # Conv2d(3*dim, 3*dim, 3, groups=3*dim, bias=False) weight -> (3*dim, 3, 3)
    w_dw = jax.random.normal(k2, (3 * dim, 3, 3), jnp.float32) * 0.2
    # Conv2d(dim, dim, 1, bias=False) weight -> (dim, dim)
    w_proj = jax.random.normal(k3, (dim, dim), jnp.float32) * 0.2
    # temperature parameter (init ones in the module; perturbed deterministically)
    temperature = jnp.ones((num_heads, 1, 1), jnp.float32) \
        + 0.1 * jax.random.normal(k4, (num_heads, 1, 1), jnp.float32)

    # tile_p=128 -> 2 P-tiles per image, exercising the streamed accumulation path.
    y = attention_forward(x, w_qkv, w_dw, w_proj, temperature, num_heads, tile_p=128)
    y = jax.block_until_ready(y)

    y_ref = reference_forward(x, w_qkv, w_dw, w_proj, temperature, num_heads)
    y_ref = jax.block_until_ready(y_ref)

    assert y.shape == (B, dim, H, W)
    err = float(jnp.max(jnp.abs(y - y_ref)))
    # bf16 MXU operands + bf16 qkv intermediate (f32 accumulation) => looser tolerance.
    assert jnp.allclose(y, y_ref, atol=2e-2, rtol=2e-2), f"max abs err {err}"

    print("KERNEL_OK")
</pallas_src>

<mosaic_0001>
module attributes {stable_mosaic.version = 11 : i64} {
  func.func @kernel(%arg0: i32, %arg1: memref<1x8x256xf32, #tpu.memory_space<vmem>>, %arg2: memref<24x8xbf16, #tpu.memory_space<vmem>>, %arg3: memref<9x24x1xf32, #tpu.memory_space<vmem>>, %arg4: memref<1x24x256xbf16, #tpu.memory_space<vmem>>, %arg5: memref<24x512xf32, #tpu.memory_space<vmem>>) attributes {dimension_semantics = [#tpu.dimension_semantics<parallel>], iteration_bounds = array<i64: 2>, scalar_prefetch = 0 : i64, scratch_operands = 1 : i64, tpu.core_type = #tpu.core_type<tc>, window_params = [{transform_indices = @transform_0, window_bounds = array<i64: 1, 8, 256>}, {pipeline_mode = #tpu.pipeline_mode<synchronous>, transform_indices = @transform_1, window_bounds = array<i64: 24, 8>}, {pipeline_mode = #tpu.pipeline_mode<synchronous>, transform_indices = @transform_2, window_bounds = array<i64: 9, 24, 1>}, {transform_indices = @transform_3, window_bounds = array<i64: 1, 24, 256>}]} {
    %c0_i32 = arith.constant 0 : i32
    %0 = arith.cmpi eq, %arg0, %c0_i32 : i32
    %1 = arith.extui %0 : i1 to i32
    %c0_i32_0 = arith.constant 0 : i32
    %2 = arith.cmpi ne, %1, %c0_i32_0 : i32
    scf.if %2 {
      %cst_42 = arith.constant 0.000000e+00 : f32
      %113 = vector.broadcast %cst_42 : f32 to vector<24x128xf32>
      %c0_43 = arith.constant 0 : index
      %c0_44 = arith.constant 0 : index
      %114 = vector.load %arg5[%c0_43, %c0_44] : memref<24x512xf32, #tpu.memory_space<vmem>>, vector<24x128xf32>
      tpu.vector_store %arg5[%c0_43, %c0_44], %113 {strides = array<i32>} : memref<24x512xf32, #tpu.memory_space<vmem>>, vector<24x128xf32>,
      %cst_45 = arith.constant 0.000000e+00 : f32
      %115 = vector.broadcast %cst_45 : f32 to vector<24x128xf32>
      %c0_46 = arith.constant 0 : index
      %c384 = arith.constant 384 : index
      %116 = vector.load %arg5[%c0_46, %c384] : memref<24x512xf32, #tpu.memory_space<vmem>>, vector<24x128xf32>
      tpu.vector_store %arg5[%c0_46, %c384], %115 {strides = array<i32>} : memref<24x512xf32, #tpu.memory_space<vmem>>, vector<24x128xf32>,
    } else {
    }
    %c0 = arith.constant 0 : index
    %c0_1 = arith.constant 0 : index
    %c0_2 = arith.constant 0 : index
    %3 = vector.load %arg1[%c0, %c0_1, %c0_2] : memref<1x8x256xf32, #tpu.memory_space<vmem>>, vector<1x8x256xf32>
    %4 = vector.shape_cast %3 : vector<1x8x256xf32> to vector<8x256xf32>
    %5 = arith.truncf %4 : vector<8x256xf32> to vector<8x256xbf16>
    %c0_3 = arith.constant 0 : index
    %c0_4 = arith.constant 0 : index
    %6 = vector.load %arg2[%c0_3, %c0_4] : memref<24x8xbf16, #tpu.memory_space<vmem>>, vector<24x8xbf16>
    %cst = arith.constant dense<0.000000e+00> : vector<24x256xf32>
    %7 = tpu.matmul %6, %5, %cst {dimension_numbers = #tpu.dot_dimension_numbers<[1], [0], [0], [1], [0, 0, 1, 1], [], []>} : vector<24x8xbf16>, vector<8x256xbf16>, vector<24x256xf32> -> vector<24x256xf32>
    %c0_5 = arith.constant 0 : index
    %c128 = arith.constant 128 : index
    %8 = vector.load %arg5[%c0_5, %c128] : memref<24x512xf32, #tpu.memory_space<vmem>>, vector<24x256xf32>
    tpu.vector_store %arg5[%c0_5, %c128], %7 {strides = array<i32>} : memref<24x512xf32, #tpu.memory_space<vmem>>, vector<24x256xf32>,
    %c0_6 = arith.constant 0 : index
    %c0_7 = arith.constant 0 : index
    %9 = vector.load %arg5[%c0_6, %c0_7] : memref<24x512xf32, #tpu.memory_space<vmem>>, vector<24x512xf32>
    %10 = tpu.iota {dimensions = array<i32: 1>} : vector<1x256xi32>
    %c16_i32 = arith.constant 16 : i32
    %c0_i32_8 = arith.constant 0 : i32
    %11 = arith.cmpi eq, %c16_i32, %c0_i32_8 : i32
    %c1_i32 = arith.constant 1 : i32
    %12 = arith.select %11, %c1_i32, %c16_i32 : i32
    %13 = vector.broadcast %12 : i32 to vector<1x256xi32>
    %14 = arith.remsi %10, %13 : vector<1x256xi32>
    %c0_i32_9 = arith.constant 0 : i32
    %15 = vector.broadcast %c0_i32_9 : i32 to vector<1x256xi32>
    %16 = arith.cmpi ne, %14, %15 : vector<1x256xi32>
    %c0_i32_10 = arith.constant 0 : i32
    %17 = vector.broadcast %c0_i32_10 : i32 to vector<1x256xi32>
    %18 = arith.cmpi slt, %14, %17 : vector<1x256xi32>
    %c0_i32_11 = arith.constant 0 : i32
    %19 = arith.cmpi slt, %12, %c0_i32_11 : i32
    %20 = vector.broadcast %19 : i1 to vector<1x256xi1>
    %21 = vector.broadcast %20 : vector<1x256xi1> to vector<1x256xi1>
    %22 = arith.xori %18, %21 : vector<1x256xi1>
    %23 = arith.andi %22, %16 : vector<1x256xi1>
    %24 = vector.broadcast %12 : i32 to vector<1x256xi32>
    %25 = arith.addi %14, %24 : vector<1x256xi32>
    %26 = arith.select %23, %25, %14 : vector<1x256xi1>, vector<1x256xi32>
    %c0_i32_12 = arith.constant 0 : i32
    %27 = vector.broadcast %c0_i32_12 : i32 to vector<1x256xi32>
    %28 = arith.cmpi ne, %26, %27 : vector<1x256xi32>
    %c15_i32 = arith.constant 15 : i32
    %29 = vector.broadcast %c15_i32 : i32 to vector<1x256xi32>
    %30 = arith.cmpi ne, %26, %29 : vector<1x256xi32>
    %cst_13 = arith.constant 0.000000e+00 : f32
    %31 = vector.broadcast %cst_13 : f32 to vector<24x256xf32>
    %32 = vector.extract_strided_slice %9 {offsets = [0, 111], sizes = [24, 256], strides = [1, 1]} : vector<24x512xf32> to vector<24x256xf32>
    %cst_14 = arith.constant 0.000000e+00 : f32
    %33 = vector.shape_cast %28 : vector<1x256xi1> to vector<1x256xi1>
    %34 = vector.broadcast %33 : vector<1x256xi1> to vector<24x256xi1>
    %35 = vector.broadcast %cst_14 : f32 to vector<24x256xf32>
    %36 = arith.select %34, %32, %35 : vector<24x256xi1>, vector<24x256xf32>
    %c0_15 = arith.constant 0 : index
    %c0_16 = arith.constant 0 : index
    %c0_17 = arith.constant 0 : index
    %37 = vector.load %arg3[%c0_15, %c0_16, %c0_17] : memref<9x24x1xf32, #tpu.memory_space<vmem>>, vector<1x24x1xf32>
    %38 = vector.shape_cast %37 : vector<1x24x1xf32> to vector<24x1xf32>
    %39 = vector.broadcast %38 : vector<24x1xf32> to vector<24x256xf32>
    %40 = arith.mulf %39, %36 : vector<24x256xf32>
    %41 = arith.addf %31, %40 : vector<24x256xf32>
    %42 = vector.extract_strided_slice %9 {offsets = [0, 112], sizes = [24, 256], strides = [1, 1]} : vector<24x512xf32> to vector<24x256xf32>
    %c1 = arith.constant 1 : index
    %c0_18 = arith.constant 0 : index
    %c0_19 = arith.constant 0 : index
    %43 = vector.load %arg3[%c1, %c0_18, %c0_19] : memref<9x24x1xf32, #tpu.memory_space<vmem>>, vector<1x24x1xf32>
    %44 = vector.shape_cast %43 : vector<1x24x1xf32> to vector<24x1xf32>
    %45 = vector.broadcast %44 : vector<24x1xf32> to vector<24x256xf32>
    %46 = arith.mulf %45, %42 : vector<24x256xf32>
    %47 = arith.addf %41, %46 : vector<24x256xf32>
    %48 = vector.extract_strided_slice %9 {offsets = [0, 113], sizes = [24, 256], strides = [1, 1]} : vector<24x512xf32> to vector<24x256xf32>
    %cst_20 = arith.constant 0.000000e+00 : f32
    %49 = vector.shape_cast %30 : vector<1x256xi1> to vector<1x256xi1>
    %50 = vector.broadcast %49 : vector<1x256xi1> to vector<24x256xi1>
    %51 = vector.broadcast %cst_20 : f32 to vector<24x256xf32>
    %52 = arith.select %50, %48, %51 : vector<24x256xi1>, vector<24x256xf32>
    %c2 = arith.constant 2 : index
    %c0_21 = arith.constant 0 : index
    %c0_22 = arith.constant 0 : index
    %53 = vector.load %arg3[%c2, %c0_21, %c0_22] : memref<9x24x1xf32, #tpu.memory_space<vmem>>, vector<1x24x1xf32>
    %54 = vector.shape_cast %53 : vector<1x24x1xf32> to vector<24x1xf32>
    %55 = vector.broadcast %54 : vector<24x1xf32> to vector<24x256xf32>
    %56 = arith.mulf %55, %52 : vector<24x256xf32>
    %57 = arith.addf %47, %56 : vector<24x256xf32>
    %58 = vector.extract_strided_slice %9 {offsets = [0, 127], sizes = [24, 256], strides = [1, 1]} : vector<24x512xf32> to vector<24x256xf32>
    %cst_23 = arith.constant 0.000000e+00 : f32
    %59 = vector.shape_cast %28 : vector<1x256xi1> to vector<1x256xi1>
    %60 = vector.broadcast %59 : vector<1x256xi1> to vector<24x256xi1>
    %61 = vector.broadcast %cst_23 : f32 to vector<24x256xf32>
    %62 = arith.select %60, %58, %61 : vector<24x256xi1>, vector<24x256xf32>
    %c3 = arith.constant 3 : index
    %c0_24 = arith.constant 0 : index
    %c0_25 = arith.constant 0 : index
    %63 = vector.load %arg3[%c3, %c0_24, %c0_25] : memref<9x24x1xf32, #tpu.memory_space<vmem>>, vector<1x24x1xf32>
    %64 = vector.shape_cast %63 : vector<1x24x1xf32> to vector<24x1xf32>
    %65 = vector.broadcast %64 : vector<24x1xf32> to vector<24x256xf32>
    %66 = arith.mulf %65, %62 : vector<24x256xf32>
    %67 = arith.addf %57, %66 : vector<24x256xf32>
    %68 = vector.extract_strided_slice %9 {offsets = [0, 128], sizes = [24, 256], strides = [1, 1]} : vector<24x512xf32> to vector<24x256xf32>
    %c4 = arith.constant 4 : index
    %c0_26 = arith.constant 0 : index
    %c0_27 = arith.constant 0 : index
    %69 = vector.load %arg3[%c4, %c0_26, %c0_27] : memref<9x24x1xf32, #tpu.memory_space<vmem>>, vector<1x24x1xf32>
    %70 = vector.shape_cast %69 : vector<1x24x1xf32> to vector<24x1xf32>
    %71 = vector.broadcast %70 : vector<24x1xf32> to vector<24x256xf32>
    %72 = arith.mulf %71, %68 : vector<24x256xf32>
    %73 = arith.addf %67, %72 : vector<24x256xf32>
    %74 = vector.extract_strided_slice %9 {offsets = [0, 129], sizes = [24, 256], strides = [1, 1]} : vector<24x512xf32> to vector<24x256xf32>
    %cst_28 = arith.constant 0.000000e+00 : f32
    %75 = vector.shape_cast %30 : vector<1x256xi1> to vector<1x256xi1>
    %76 = vector.broadcast %75 : vector<1x256xi1> to vector<24x256xi1>
    %77 = vector.broadcast %cst_28 : f32 to vector<24x256xf32>
    %78 = arith.select %76, %74, %77 : vector<24x256xi1>, vector<24x256xf32>
    %c5 = arith.constant 5 : index
    %c0_29 = arith.constant 0 : index
    %c0_30 = arith.constant 0 : index
    %79 = vector.load %arg3[%c5, %c0_29, %c0_30] : memref<9x24x1xf32, #tpu.memory_space<vmem>>, vector<1x24x1xf32>
    %80 = vector.shape_cast %79 : vector<1x24x1xf32> to vector<24x1xf32>
    %81 = vector.broadcast %80 : vector<24x1xf32> to vector<24x256xf32>
    %82 = arith.mulf %81, %78 : vector<24x256xf32>
    %83 = arith.addf %73, %82 : vector<24x256xf32>
    %84 = vector.extract_strided_slice %9 {offsets = [0, 143], sizes = [24, 256], strides = [1, 1]} : vector<24x512xf32> to vector<24x256xf32>
    %cst_31 = arith.constant 0.000000e+00 : f32
    %85 = vector.shape_cast %28 : vector<1x256xi1> to vector<1x256xi1>
    %86 = vector.broadcast %85 : vector<1x256xi1> to vector<24x256xi1>
    %87 = vector.broadcast %cst_31 : f32 to vector<24x256xf32>
    %88 = arith.select %86, %84, %87 : vector<24x256xi1>, vector<24x256xf32>
    %c6 = arith.constant 6 : index
    %c0_32 = arith.constant 0 : index
    %c0_33 = arith.constant 0 : index
    %89 = vector.load %arg3[%c6, %c0_32, %c0_33] : memref<9x24x1xf32, #tpu.memory_space<vmem>>, vector<1x24x1xf32>
    %90 = vector.shape_cast %89 : vector<1x24x1xf32> to vector<24x1xf32>
    %91 = vector.broadcast %90 : vector<24x1xf32> to vector<24x256xf32>
    %92 = arith.mulf %91, %88 : vector<24x256xf32>
    %93 = arith.addf %83, %92 : vector<24x256xf32>
    %94 = vector.extract_strided_slice %9 {offsets = [0, 144], sizes = [24, 256], strides = [1, 1]} : vector<24x512xf32> to vector<24x256xf32>
    %c7 = arith.constant 7 : index
    %c0_34 = arith.constant 0 : index
    %c0_35 = arith.constant 0 : index
    %95 = vector.load %arg3[%c7, %c0_34, %c0_35] : memref<9x24x1xf32, #tpu.memory_space<vmem>>, vector<1x24x1xf32>
    %96 = vector.shape_cast %95 : vector<1x24x1xf32> to vector<24x1xf32>
    %97 = vector.broadcast %96 : vector<24x1xf32> to vector<24x256xf32>
    %98 = arith.mulf %97, %94 : vector<24x256xf32>
    %99 = arith.addf %93, %98 : vector<24x256xf32>
    %100 = vector.extract_strided_slice %9 {offsets = [0, 145], sizes = [24, 256], strides = [1, 1]} : vector<24x512xf32> to vector<24x256xf32>
    %cst_36 = arith.constant 0.000000e+00 : f32
    %101 = vector.shape_cast %30 : vector<1x256xi1> to vector<1x256xi1>
    %102 = vector.broadcast %101 : vector<1x256xi1> to vector<24x256xi1>
    %103 = vector.broadcast %cst_36 : f32 to vector<24x256xf32>
    %104 = arith.select %102, %100, %103 : vector<24x256xi1>, vector<24x256xf32>
    %c8 = arith.constant 8 : index
    %c0_37 = arith.constant 0 : index
    %c0_38 = arith.constant 0 : index
    %105 = vector.load %arg3[%c8, %c0_37, %c0_38] : memref<9x24x1xf32, #tpu.memory_space<vmem>>, vector<1x24x1xf32>
    %106 = vector.shape_cast %105 : vector<1x24x1xf32> to vector<24x1xf32>
    %107 = vector.broadcast %106 : vector<24x1xf32> to vector<24x256xf32>
    %108 = arith.mulf %107, %104 : vector<24x256xf32>
    %109 = arith.addf %99, %108 : vector<24x256xf32>
    %110 = arith.truncf %109 : vector<24x256xf32> to vector<24x256xbf16>
    %111 = vector.shape_cast %110 : vector<24x256xbf16> to vector<1x24x256xbf16>
    %c0_39 = arith.constant 0 : index
    %c0_40 = arith.constant 0 : index
    %c0_41 = arith.constant 0 : index
    %112 = vector.load %arg4[%c0_39, %c0_40, %c0_41] : memref<1x24x256xbf16, #tpu.memory_space<vmem>>, vector<1x24x256xbf16>
    tpu.vector_store %arg4[%c0_39, %c0_40, %c0_41], %111 {strides = array<i32>} : memref<1x24x256xbf16, #tpu.memory_space<vmem>>, vector<1x24x256xbf16>,
    return
  }
  func.func @transform_0(%arg0: i32) -> (i32, i32, i32) {
    %c0_i32 = arith.constant 0 : i32
    %c0_i32_0 = arith.constant 0 : i32
    %c0_i32_1 = arith.constant 0 : i32
    return %arg0, %c0_i32, %c0_i32_0 : i32, i32, i32
  }
  func.func @transform_1(%arg0: i32) -> (i32, i32) {
    %c0_i32 = arith.constant 0 : i32
    %c0_i32_0 = arith.constant 0 : i32
    %c0_i32_1 = arith.constant 0 : i32
    return %c0_i32, %c0_i32_0 : i32, i32
  }
  func.func @transform_2(%arg0: i32) -> (i32, i32, i32) {
    %c0_i32 = arith.constant 0 : i32
    %c0_i32_0 = arith.constant 0 : i32
    %c0_i32_1 = arith.constant 0 : i32
    %c0_i32_2 = arith.constant 0 : i32
    return %c0_i32, %c0_i32_0, %c0_i32_1 : i32, i32, i32
  }
  func.func @transform_3(%arg0: i32) -> (i32, i32, i32) {
    %c0_i32 = arith.constant 0 : i32
    %c0_i32_0 = arith.constant 0 : i32
    %c0_i32_1 = arith.constant 0 : i32
    return %arg0, %c0_i32, %c0_i32_0 : i32, i32, i32
  }
}

</mosaic_0001>

<bundles_post_ra>
// kernel: tpu_custom_call.1
= control target key start
LH: loop header
LB: loop body
LE: loop exit
PB: predicated region body
PF: predicated region fallthrough
CT: control target
= control target key end

     0   :  { %8 = vsyncpa [#allocation4], 0  ;;  %s1775_s0 = inlined_call_operand.vmem [shape: f32[2,8,256], index: 0, kind: input, shape index: {}]   ;;  %s1776_s1 = inlined_call_operand.vmem [shape: bf16[24,8], index: 1, kind: input, shape index: {}]   ;;  %s1777_s2 = inlined_call_operand.vmem [shape: f32[9,24,1], index: 2, kind: input, shape index: {}]   ;;  %s1778_s3 = inlined_call_operand.hbm [shape: bf16[2,24,256], index: 3, kind: output, shape index: {}]  }
   0x1   :  { %10 = vsyncpa [#allocation4 + $0x1], 0  ;;  %s1182_s12 = smov 0   ;;  %s1184_s13 = smov 0  }
   0x2   :  { %s1186_s14 = smov 0   ;;  %s1188_s15 = smov 0  }
   0x3 LB: > { %s1203_s16 = sadd.s32 4294967295, %s1148_s15   ;;  %s984_s17 = sadd.s32 4294967294, %s1148_s15   ;;  %s1148_s15 = sphi %s1188_s15, %s1792_s15   ;;  %s1144_s14 = sphi %s1186_s14, %s1791_s14   ;;  %s1140_s13 = sphi %s1184_s13, %s1790_s13   ;;  %s1136_s12 = sphi %s1182_s12, %s1789_s12  }
   0x4   : > { %s1207_s18 = sadd.s32 1, %s1148_s15   ;;  %s91_s19 = sadd.s32 1, %s1144_s14 }
   0x5   : > { %s88_s20 = ssub.s32 %s1148_s15, %s1207_s18  ;;  %p101_p0 = scmp.ne.s32.totalorder %s1144_s14, %s1140_s13 }
   0x6   : > { %p89_p1 = scmp.eq.s32.totalorder %s88_s20, 0  ;;  %p102_p2 = scmp.eq.s32.totalorder %s1203_s16, 1 }
   0x7   : > { %p107_p3 = scmp.ne.s32.totalorder %s1140_s13, %s1136_s12  ;;  %p108_p4 = scmp.eq.s32.totalorder %s984_s17, 1 }
   0x8   : > { %s1218_s21 = scalar_select %p89_p1, %s1144_s14, %s91_s19  }
   0x9   : > { %p1220_p5 = por %p102_p2, %p101_p0  ;;  %p1224_p6 = por %p108_p4, %p107_p3 }
   0xa   : > { %p987_p7 = scmp.ge.s32.totalorder %s1148_s15, 1  ;;  %p140_p8 = scmp.lt.s32.totalorder %s1148_s15, 3 }
   0xc   : > { %p141_p9 = pnand %p987_p7, %p140_p8 }
   0xd   : > { %s161_s24 = sand.u32 (!%p141_p9), 1, %s1140_s13   ;;  %p164_p10 = scmp.lt.s32.totalorder (!%p141_p9), %s1203_s16, 1 }
   0xe   : > { %144 = sbr.rel (%p141_p9) target bundleno = 584 (0x248), region = 32  ;;  %p990_p11 = scmp.ne.s32.totalorder (!%p141_p9), %s1203_s16, 0 }
   0xf   : > { %s1030_s25 = smul.u32 (!%p141_p9), 24, %s161_s24 }
  0x11   : > { %s1238_s4 = scalar_lea.vmem (!%p141_p9), [#allocation3], %s1030_s25 }
  0x13   : > { %s165_s26 = scalar_select %p164_p10, %s1203_s16, 1 }
  0x14   : > { %173 = sbr.rel (%p990_p11) target bundleno = 32 (0x20), region = 36 }
  0x15   : > { %s1026_s27 = sshll.u32 %s165_s26, 4 }
  0x16   : > { %s168_s30 = scalar_lea.vmem %s1775_s0, %s1026_s27 }
  0x19   : > { %v1150_v0 = vmov 0.0  }
  0x1a   : > { %174 = vst [vmem:[#allocation2 + $0x8] sm:$0xff] %v1150_v0 }
  0x1b   : > { %175 = vst [vmem:[#allocation2] sm:$0xff] %v1150_v0 }
  0x1c   : > { %176 = vst [vmem:[#allocation2 + $0x50] sm:$0xff] %v1150_v0 }
  0x1d   : > { %177 = vst [vmem:[#allocation2 + $0x18] sm:$0xff] %v1150_v0 }
  0x1e   : > { %178 = vst [vmem:[#allocation2 + $0x48] sm:$0xff] %v1150_v0 }
  0x1f   : > { %179 = vst [vmem:[#allocation2 + $0x38] sm:$0xff] %v1150_v0 }
  0x20 PF: > { %v180_v3 = vld [vmem:[%s168_s30] sm:$0xff]  ;;  %vm202_vm0 = vcmask 1043456   ;;  %s1151_s5 = smov 17   ;;  %v1152_v5 = vmov 0   ;;  %v181_v6 = vld [vmem:[%s168_s30 + $0x8] sm:$0xff]  ;;  %v346_v11 = vld [vmem:[%s1777_s2 + $0x10] sm:$0xff] }
  0x21   : > { %v1243_v2 = vld [vmem:[#allocation2 + $0x8] sm:$0xff]  ;;  %v182_v4 = vpack.c.bf16 %v180_v3, %v180_v3  ;;  %1084 = vset.pattern.permute.xlu1 %v1152_v5  ;;  %1083 = vset.pattern.permute.xlu0 %v1152_v5  ;;  %v1027_v8 = vld [vmem:[%s1776_s1] sm:$0xff]  ;;  %v183_v9 = vpack.c.bf16 %v181_v6, %v181_v6  ;;  %vm195_vm1 = vcmask 64512   ;;  %v999_v18 = vld [vmem:[%s1777_s2 + $0x18] sm:$0xff]  ;;  %s1153_s9 = smov 15   ;;  %s1154_s7 = smov 1   ;;  %v263_v6 = vlaneseq }
  0x22   : > { %v1241_v1 = vld [vmem:[#allocation2] sm:$0xff]  ;;  %307 = vrot.lane.b32.xlu0 %v1243_v2, %s1151_s5  ;;  %v186_v10 = vld [vmem:[%s1776_s1 + $0x8] sm:$0xf]  ;;  %1085 = vset.pattern.permute.xlu2 %v1152_v5  ;;  %v1003_v20 = vld [vmem:[%s1777_s2 + $0x38] sm:$0xff]  ;;  %s1155_s11 = smov 127   ;;  %s1156_s17 = smov 16  }
  0x23   : > { %313 = vrot.lane.b32.xlu1 %v1241_v1, %s1151_s5  ;;  %v204_v7 = vsel %vm202_vm0, %v182_v4, 0  ;;  %v192_v12 = vunpack.c.l.b16 %v186_v10  ;;  %v207_v13 = vsel %vm202_vm0, %v183_v9, 0  ;;  %359 = vperm.xlu2 %1085, %v346_v11   ;;  %v345_v14 = vld [vmem:[%s1777_s2 + $0x8] sm:$0xff]  ;;  %v1263_v15 = vld [vmem:[#allocation2 + $0x50] sm:$0xff]  ;;  %v1000_v17 = vld [vmem:[%s1777_s2 + $0x20] sm:$0xff]  ;;  %v264_v9 = vand.u32 127, %v263_v6 }
  0x24   : > { %216 = vmatpush.bf16.msra.mxu0 %v204_v7  ;;  %1028 = vmatpush.bf16.msra.mxu2 %v204_v7  ;;  %v344_v19 = vld [vmem:[%s1777_s2] sm:$0xff]  ;;  %v1001_v21 = vld [vmem:[%s1777_s2 + $0x28] sm:$0xff]  ;;  %v1006_v22 = vld [vmem:[%s1777_s2 + $0x50] sm:$0xff]  ;;  %vm538_vm2 = vcmask 7168   ;;  %vm640_vm4 = vcmask 1039360   ;;  %vm470_vm5 = vcmask 121856  }
  0x25   : > { %234 = vmatpush.bf16.msra.mxu1 %v207_v13  ;;  %1029 = vmatpush.bf16.msra.mxu3 %v207_v13  ;;  %v194_v16 = vpack.c.b16 %v192_v12, %v192_v12  ;;  %v1004_v23 = vld [vmem:[%s1777_s2 + $0x40] sm:$0xff]  ;;  %v1009_v24 = vld [vmem:[%s1777_s2 + $0x68] sm:$0xff]  ;;  %v1007_v25 = vld [vmem:[%s1777_s2 + $0x58] sm:$0xff]  ;;  %v270_v11 = vand.u32 15, %v264_v9  ;;  %vm325_vm6 = vcmask 138240   ;;  %vm429_vm8 = vcmask 130048  }
  0x26   : > { %v1002_v26 = vld [vmem:[%s1777_s2 + $0x30] sm:$0xff]  ;;  %v1005_v28 = vld [vmem:[%s1777_s2 + $0x48] sm:$0xff]  ;;  %v1315_v29 = vld [vmem:[#allocation2 + $0x18] sm:$0xff]  ;;  %vm708_vm11 = vcmask 924672   ;;  %s1159_s27 = smov 111   ;;  %vm813_vm12 = vcmask 916480  }
  0x27   : > { %995 = vmatmul.msk.bf16.vlgmr.msra.gmra.mxu0 %vm195_vm1, %v1027_v8  ;;  %996 = vmatmul.msk.bf16.vlgmr.msra.gmra.mxu2 %vm195_vm1, %v194_v16  ;;  %v1010_v27 = vld [vmem:[%s1777_s2 + $0x70] sm:$0xff]  ;;  %v1008_v50 = vld [vmem:[%s1777_s2 + $0x60] sm:$0xff]  ;;  %v1011_v60 = vld [vmem:[%s1777_s2 + $0x78] sm:$0xff]  ;;  %vm1456_vm3 = vcmp.ne.s32.totalorder %v270_v11, 0  ;;  %vm1484_vm7 = vcmp.ne.s32.totalorder %v270_v11, 15  ;;  %vm850_vm13 = vcmask 908288  }
  0x28   : > { %997 = vmatmul.msk.bf16.vlgmr.msra.gmra.mxu1 %vm195_vm1, %v1027_v8  ;;  %998 = vmatmul.msk.bf16.vlgmr.msra.gmra.mxu3 %vm195_vm1, %v194_v16  ;;  %v1435_v4 = vld [vmem:[#allocation2 + $0x38] sm:$0xff]  ;;  %v1013_v10 = vld [vmem:[%s1777_s2 + $0x88] sm:$0xff]  ;;  %s1031_s10 = smul.u32 24, %s1203_s16  ;;  %s919_s19 = sshll.u32 %s1238_s4, 4  ;;  %s920_s19 = int_to_ptr.vmem [resolvable:$true] %s919_s19 }
  0x29   : > { %s907_s25 = scalar_lea.sflag [#allocation4], %s161_s24  ;;  %s1106_s28 = scalar_lea.hbm %s1778_s3, 48 }
  0x2a   : > { %319 = vrot.lane.b32.xlu0 %v1263_v15, %s1151_s5  ;;  %s918_s16 = scalar_lea.hbm %s1778_s3, %s1031_s10 }
  0x2b   : > { %354 = vperm.xlu1 %1084, %v345_v14   ;;  %385 = vperm.xlu2 %1085, %v1000_v17   ;;  %s921_s20 = sshll.u32 %s918_s16, 4  ;;  %s922_s20 = int_to_ptr.hbm [resolvable:$true] %s921_s20 }
  0x2c   : > { %s1100_s26 = sshra.s32 %s922_s20, 4  ;;  %s1101_s26 = int_to_ptr.hbm [resolvable:$true] %s1100_s26 }
  0x2d   : > { %p1107_p1 = scmp.lt.s32.totalorder %s1101_s26, %s1778_s3 }
  0x32   : > { %349 = vperm.xlu0 %1083, %v344_v19   ;;  %v1014_v19 = vld [vmem:[%s1777_s2 + $0x90] sm:$0xff] }
  0x33   : > { %380 = vperm.xlu1 %1084, %v999_v18   ;;  %500 = vperm.xlu2 %1085, %v1003_v20  }
  0x3a   : > { %390 = vperm.xlu0 %1083, %v1001_v21  }
  0x3b   : > { %452 = vrot.lane.b32.xlu1 %v1243_v2, %s1153_s9  ;;  %568 = vperm.xlu2 %1085, %v1006_v22  }
  0x42   : > { %505 = vperm.xlu0 %1083, %v1004_v23  }
  0x43   : > { %458 = vrot.lane.b32.xlu1 %v1241_v1, %s1153_s9  ;;  %599 = vperm.xlu2 %1085, %v1009_v24   ;;  %v1017_v24 = vld [vmem:[%s1777_s2 + $0xa8] sm:$0xff] }
  0x4a   : > { %573 = vperm.xlu0 %1083, %v1007_v25  }
  0x4b   : > { %464 = vrot.lane.b32.xlu1 %v1263_v15, %s1153_s9 }
  0x52   : > { %604 = vperm.xlu0 %1083, %v1010_v27  }
  0x53   : > { %495 = vperm.xlu1 %1084, %v1002_v26  }
  0x5a   : > { %626 = vrot.lane.b32.xlu0 %v1315_v29, %s1155_s11 }
  0x5b   : > { %520 = vrot.lane.b32.xlu1 %v1243_v2, %s1154_s7 }
  0x63   : > { %526 = vrot.lane.b32.xlu1 %v1241_v1, %s1154_s7 }
  0x6b   : > { %532 = vrot.lane.b32.xlu1 %v1263_v15, %s1154_s7 }
  0x73   : > { %563 = vperm.xlu1 %1084, %v1005_v28  }
  0x7d   : > { %v1327_v34 = vpop.permute.xlu2 %359 }
  0x85   : > { %v1341_v40 = vpop.permute.xlu2 %385 }
  0x86   : > { %v396_v41 = vmul.f32 %v1341_v40, %v1241_v1  ;;  %v1423_v1 = vld [vmem:[#allocation2 + $0x48] sm:$0xff] }
  0x8d   : > { %v1403_v58 = vpop.permute.xlu2 %500 }
  0x94   : > { %v1321_v31 = vpop.permute.xlu0 %307 }
  0x95   : > { %v1319_v30 = vpop.permute.xlu1 %313  ;;  %v1417_v63 = vpop.permute.xlu2 %568 }
  0x9c   : > { %v1325_v33 = vpop.permute.xlu0 %319 }
  0x9d   : > { %v1323_v32 = vpop.permute.xlu1 %354  ;;  %v1433_v3 = vpop.permute.xlu2 %599 }
  0xa4   : > { %v1330_v37 = vpop.f32.mrf.mxu0  ;;  %v1337_v38 = vpop.permute.xlu0 %349 }
  0xa5   : > { %v381_v35 = vpop.permute.xlu1 %380  ;;  %454 = vrot.lane.b32.xlu2 %v1330_v37, %s1153_s9  ;;  %309 = vrot.lane.b32.xlu0 %v1330_v37, %s1151_s5  ;;  %v1339_v39 = vpop.f32.mrf.mxu1 }
  0xa6   : > { %v393_v36 = vmul.f32 %v381_v35, %v1243_v2  ;;  %v395_v51 = vmul.f32 %v381_v35, %v1339_v39  ;;  %v394_v52 = vmul.f32 %v381_v35, %v1330_v37 }
  0xa8   : > { %411 = vrot.lane.b32.xlu1 %v393_v36, %s1156_s17 }
  0xaa   : > { %v1347_v43 = vpop.f32.mrf.mxu2 }
  0xab   : > { %v1353_v44 = vpop.f32.mrf.mxu3 }
  0xac   : > { %v1345_v42 = vpop.f32.mrf.mxu0  ;;  %v391_v46 = vpop.permute.xlu0 %390 }
  0xad   : > { %522 = vrot.lane.b32.xlu2 %v1330_v37, %s1154_s7  ;;  %456 = vrot.lane.b32.xlu0 %v1339_v39, %s1153_s9  ;;  %v1356_v45 = vpop.f32.mrf.mxu1  ;;  %v399_v47 = vmul.f32 %v391_v46, %v1263_v15  ;;  %v1371_v53 = vpop.permute.xlu1 %452  ;;  %v401_v55 = vmul.f32 %v391_v46, %v1353_v44  ;;  %v400_v62 = vmul.f32 %v391_v46, %v1347_v43 }
  0xae   : > { %v398_v61 = vmul.f32 %v1341_v40, %v1356_v45  ;;  %v397_v20 = vmul.f32 %v1341_v40, %v1345_v42 }
  0xb0   : > { %417 = vrot.lane.b32.xlu1 %v396_v41, %s1156_s17 }
  0xb2   : > { %v225_v48 = vpop.f32.mrf.mxu2 }
  0xb3   : > { %v243_v49 = vpop.f32.mrf.mxu3  ;;  %v1012_v48 = vld [vmem:[%s1777_s2 + $0x80] sm:$0xff] }
  0xb4   : > { %v1421_v0 = vpop.permute.xlu0 %505 }
  0xb5   : > { %624 = vrot.lane.b32.xlu2 %v1339_v39, %s1155_s11  ;;  %524 = vrot.lane.b32.xlu0 %v1339_v39, %s1154_s7  ;;  %v1379_v54 = vpop.permute.xlu1 %458 }
  0xb8   : > { %423 = vrot.lane.b32.xlu1 %v399_v47, %s1156_s17 }
  0xbc   : > { %v1437_v5 = vpop.permute.xlu0 %573 }
  0xbd   : > { %415 = vrot.lane.b32.xlu0 %v395_v51, %s1156_s17  ;;  %413 = vrot.lane.b32.xlu2 %v394_v52, %s1156_s17  ;;  %v1393_v56 = vpop.permute.xlu1 %464 }
  0xc0   : > { %594 = vperm.xlu1 %1084, %v1008_v50  }
  0xc4   : > { %v1450_v12 = vpop.permute.xlu0 %604 }
  0xc5   : > { %468 = vrot.lane.b32.xlu0 %v1353_v44, %s1153_s9  ;;  %323 = vrot.lane.b32.xlu2 %v1353_v44, %s1151_s5  ;;  %v1401_v57 = vpop.permute.xlu1 %495 }
  0xc8   : > { %311 = vrot.lane.b32.xlu1 %v1339_v39, %s1151_s5 }
  0xcc   : > { %v627_v21 = vpop.permute.xlu0 %626 }
  0xcd   : > { %536 = vrot.lane.b32.xlu0 %v1353_v44, %s1154_s7  ;;  %466 = vrot.lane.b32.xlu2 %v1347_v43, %s1153_s9  ;;  %v521_v59 = vpop.permute.xlu1 %520 }
  0xd0   : > { %622 = vrot.lane.b32.xlu1 %v1330_v37, %s1155_s11 }
  0xd5   : > { %427 = vrot.lane.b32.xlu0 %v401_v55, %s1156_s17  ;;  %534 = vrot.lane.b32.xlu2 %v1347_v43, %s1154_s7  ;;  %v1425_v2 = vpop.permute.xlu1 %526  ;;  %v265_v55 = vadd.s32 128, %v264_v9 }
  0xd8   : > { %321 = vrot.lane.b32.xlu1 %v1347_v43, %s1151_s5 }
  0xdd   : > { %462 = vrot.lane.b32.xlu0 %v1356_v45, %s1153_s9  ;;  %315 = vrot.lane.b32.xlu2 %v1345_v42, %s1151_s5  ;;  %v1445_v7 = vpop.permute.xlu1 %532 }
  0xe0   : > { %628 = vrot.lane.b32.xlu1 %v1345_v42, %s1155_s11 }
  0xe5   : > { %530 = vrot.lane.b32.xlu0 %v1356_v45, %s1154_s7  ;;  %317 = vrot.lane.b32.xlu2 %v1356_v45, %s1151_s5  ;;  %s1157_s5 = smov 113   ;;  %v564_v16 = vpop.permute.xlu1 %563 }
  0xe8   : > { %634 = vrot.lane.b32.xlu1 %v1347_v43, %s1155_s11 }
  0xed   : > { %421 = vrot.lane.b32.xlu0 %v398_v61, %s1156_s17  ;;  %425 = vrot.lane.b32.xlu2 %v400_v62, %s1156_s17  ;;  %v1016_v61 = vld [vmem:[%s1777_s2 + $0xa0] sm:$0xff]  ;;  %v277_v62 = vand.u32 15, %v265_v55 }
  0xef   : > { %vm1512_vm9 = vcmp.ne.s32.totalorder %v277_v62, 0  ;;  %vm1533_vm10 = vcmp.ne.s32.totalorder %v277_v62, 15 }
  0xf0   : > { %665 = vperm.xlu1 %1084, %v1011_v60  }
  0xf5   : > { %632 = vrot.lane.b32.xlu0 %v1423_v1, %s1155_s11  ;;  %460 = vrot.lane.b32.xlu2 %v1345_v42, %s1153_s9  ;;  %s1158_s9 = smov 112  }
  0xf8   : > { %690 = vrot.lane.b32.xlu1 %v1330_v37, %s1157_s5 }
  0xfd   : > { %638 = vrot.lane.b32.xlu0 %v1435_v4, %s1155_s11  ;;  %528 = vrot.lane.b32.xlu2 %v1345_v42, %s1154_s7 }
  0xff   : > { %v455_v8 = vpop.permute.xlu2 %454 }
 0x100   : > { %696 = vrot.lane.b32.xlu1 %v1345_v42, %s1157_s5  ;;  %v471_v26 = vsel %vm470_vm5, %v1371_v53, %v455_v8 }
 0x101   : > { %v483_v40 = vsel %vm1484_vm7, %v471_v26, 0.0 }
 0x102   : > { %v508_v49 = vmul.f32 %v1401_v57, %v483_v40 }
 0x105   : > { %675 = vperm.xlu0 %1083, %v1013_v10   ;;  %630 = vrot.lane.b32.xlu2 %v1356_v45, %s1155_s11 }
 0x107   : > { %v523_v14 = vpop.permute.xlu2 %522 }
 0x108   : > { %702 = vrot.lane.b32.xlu1 %v1347_v43, %s1157_s5  ;;  %v539_v15 = vsel %vm538_vm2, %v521_v59, %v523_v14 }
 0x109   : > { %v551_v17 = vsel %vm1456_vm3, %v539_v15, 0.0 }
 0x10a   : > { %v576_v18 = vmul.f32 %v564_v16, %v551_v17 }
 0x10d   : > { %694 = vrot.lane.b32.xlu0 %v1315_v29, %s1157_s5  ;;  %419 = vrot.lane.b32.xlu2 %v397_v20, %s1156_s17 }
 0x10f   : > { %v1471_v22 = vpop.permute.xlu2 %624 }
 0x110   : > { %733 = vperm.xlu1 %1084, %v1014_v19   ;;  %v1475_v23 = vsel %vm640_vm4, %v1471_v22, %v627_v21 }
 0x115   : > { %700 = vrot.lane.b32.xlu0 %v1423_v1, %s1157_s5  ;;  %636 = vrot.lane.b32.xlu2 %v1353_v44, %s1155_s11 }
 0x117   : > { %v310_v27 = vpop.permute.xlu0 %309  ;;  %v414_v28 = vpop.permute.xlu2 %413 }
 0x118   : > { %764 = vperm.xlu1 %1084, %v1017_v24   ;;  %v326_v36 = vsel %vm325_vm6, %v1321_v31, %v310_v27 }
 0x119   : > { %v338_v41 = vsel %vm1456_vm3, %v326_v36, 0.0 }
 0x11a   : > { %v412_v35 = vpop.permute.xlu1 %411  ;;  %v362_v47 = vmul.f32 %v1337_v38, %v338_v41 }
 0x11b   : > { %v430_v46 = vsel %vm429_vm8, %v412_v35, %v414_v28 }
 0x11c   : > { %v442_v50 = vadd.f32 %v430_v46, %v362_v47 }
 0x11d   : > { %706 = vrot.lane.b32.xlu0 %v1435_v4, %s1157_s5  ;;  %670 = vperm.xlu2 %1085, %v1012_v48   ;;  %v1015_v48 = vld [vmem:[%s1777_s2 + $0x98] sm:$0xff] }
 0x11e   : > { %v514_v31 = vadd.f32 %v508_v49, %v442_v50 }
 0x11f   : > { %v457_v51 = vpop.permute.xlu0 %456  ;;  %v324_v52 = vpop.permute.xlu2 %323 }
 0x120   : > { %v472_v59 = vsel %vm470_vm5, %v455_v8, %v457_v51  ;;  %v582_v60 = vadd.f32 %v576_v18, %v514_v31  ;;  %v1019_v18 = vld [vmem:[%s1777_s2 + $0xb8] sm:$0xff] }
 0x122   : > { %v1504_v53 = vpop.permute.xlu1 %417 }
 0x125   : > { %743 = vperm.xlu0 %1083, %v1016_v61   ;;  %692 = vrot.lane.b32.xlu2 %v1339_v39, %s1157_s5 }
 0x127   : > { %v525_v10 = vpop.permute.xlu0 %524  ;;  %v467_v11 = vpop.permute.xlu2 %466 }
 0x128   : > { %v540_v9 = vsel %vm538_vm2, %v523_v14, %v525_v10 }
 0x129   : > { %v552_v8 = vsel %vm1512_vm9, %v540_v9, 0.0 }
 0x12a   : > { %v424_v15 = vpop.permute.xlu1 %423  ;;  %v577_v17 = vmul.f32 %v564_v16, %v552_v8  ;;  %v475_v8 = vsel %vm470_vm5, %v1393_v56, %v467_v11 }
 0x12d   : > { %774 = vperm.xlu0 %1083, %v1019_v18   ;;  %698 = vrot.lane.b32.xlu2 %v1356_v45, %s1157_s5 }
 0x12f   : > { %v416_v19 = vpop.permute.xlu0 %415  ;;  %v535_v20 = vpop.permute.xlu2 %534 }
 0x130   : > { %v431_v24 = vsel %vm429_vm8, %v414_v28, %v416_v19  ;;  %v484_v28 = vsel %vm1533_vm10, %v472_v59, 0.0 }
 0x131   : > { %v509_v50 = vmul.f32 %v1401_v57, %v484_v28  ;;  %v1018_v57 = vld [vmem:[%s1777_s2 + $0xb0] sm:$0xff] }
 0x132   : > { %v595_v21 = vpop.permute.xlu1 %594 }
 0x133   : > { %v607_v26 = vmul.f32 %v595_v21, %v1330_v37  ;;  %v608_v62 = vmul.f32 %v595_v21, %v1339_v39 }
 0x135   : > { %v1526_v14 = vadd.f32 %v607_v26, %v582_v60  ;;  %704 = vrot.lane.b32.xlu2 %v1353_v44, %s1157_s5  ;;  %s1102_s5 = scalar_lea.hbm %s1101_s26, 24 }
 0x136   : > { %p1103_p12 = scmp.ne.s32.totalorder %s1101_s26, %s1102_s5  ;;  %p1108_p2 = scmp.lt.s32.totalorder %s1106_s28, %s1102_s5 }
 0x137   : > { %v469_v16 = vpop.permute.xlu0 %468  ;;  %v1530_v35 = vpop.permute.xlu2 %315 }
 0x138   : > { %v476_v40 = vsel %vm470_vm5, %v467_v11, %v469_v16  ;;  %p1104_p13 = pnand %p1103_p12, %p1220_p5  ;;  %p1109_p3 = por %p1108_p2, %p1107_p1 }
 0x139   : > { %v488_v56 = vsel %vm1533_vm10, %v476_v40, 0.0 }
 0x13a   : > { %v312_v36 = vpop.permute.xlu1 %311  ;;  %v513_v40 = vmul.f32 %v1421_v0, %v488_v56  ;;  %p1105_p0 = pneg %p1104_p13 }
 0x13b   : > { %v327_v46 = vsel %vm325_vm6, %v310_v27, %v312_v36  ;;  %v487_v36 = vsel %vm1484_vm7, %v475_v8, 0.0 }
 0x13c   : > { %v339_v47 = vsel %vm1512_vm9, %v327_v46, 0.0  ;;  %p1110_p4 = pnand %p1109_p3, %p1105_p0 }
 0x13d   : > { %v363_v49 = vmul.f32 %v1337_v38, %v339_v47  ;;  %738 = vperm.xlu2 %1085, %v1015_v48  }
 0x13f   : > { %v443_v31 = vadd.f32 %v431_v24, %v363_v49  ;;  %v537_v55 = vpop.permute.xlu0 %536  ;;  %v318_v60 = vpop.permute.xlu2 %317 }
 0x140   : > { %v544_v61 = vsel %vm538_vm2, %v535_v20, %v537_v55  ;;  %v1550_v59 = vsel %vm325_vm6, %v1530_v35, %v318_v60 }
 0x141   : > { %v515_v51 = vadd.f32 %v509_v50, %v443_v31 }
 0x142   : > { %v623_v27 = vpop.permute.xlu1 %622 }
 0x143   : > { %v641_v10 = vsel %vm640_vm4, %v623_v27, %v1471_v22  ;;  %v583_v38 = vadd.f32 %v577_v17, %v515_v51  ;;  %v543_v22 = vsel %vm538_vm2, %v1445_v7, %v535_v20  ;;  %v512_v20 = vmul.f32 %v1421_v0, %v487_v36 }
 0x144   : > { %v611_v27 = vmul.f32 %v1450_v12, %v1347_v43 }
 0x145   : > { %v614_v9 = vadd.f32 %v608_v62, %v583_v38  ;;  %769 = vperm.xlu2 %1085, %v1018_v57  }
 0x147   : > { %v428_v18 = vpop.permute.xlu0 %427  ;;  %v426_v19 = vpop.permute.xlu2 %425 }
 0x148   : > { %v434_v26 = vsel %vm429_vm8, %v424_v15, %v426_v19  ;;  %v435_v21 = vsel %vm429_vm8, %v426_v19, %v428_v18 }
 0x14a   : > { %v322_v24 = vpop.permute.xlu1 %321 }
 0x14b   : > { %v330_v17 = vsel %vm325_vm6, %v1325_v33, %v322_v24  ;;  %v331_v16 = vsel %vm325_vm6, %v322_v24, %v324_v52  ;;  %v555_v33 = vsel %vm1456_vm3, %v543_v22, 0.0  ;;  %v556_v52 = vsel %vm1512_vm9, %v544_v61, 0.0 }
 0x14c   : > { %v342_v11 = vsel %vm1456_vm3, %v330_v17, 0.0  ;;  %v343_v15 = vsel %vm1512_vm9, %v331_v16, 0.0  ;;  %v580_v48 = vmul.f32 %v1437_v5, %v555_v33  ;;  %v581_v49 = vmul.f32 %v1437_v5, %v556_v52 }
 0x14d   : > { %v366_v46 = vmul.f32 %v1327_v34, %v342_v11  ;;  %v367_v7 = vmul.f32 %v1327_v34, %v343_v15  ;;  %v612_v61 = vmul.f32 %v1450_v12, %v1353_v44  ;;  %v654_v12 = vsel %vm1533_vm10, %v1475_v23, 0.0 }
 0x14e   : > { %v328_v16 = vsel %vm325_vm6, %v1319_v30, %v1530_v35  ;;  %v341_v23 = vsel %vm1512_vm9, %v1550_v59, 0.0 }
 0x14f   : > { %v446_v28 = vadd.f32 %v434_v26, %v366_v46  ;;  %v447_v47 = vadd.f32 %v435_v21, %v367_v7  ;;  %v463_v51 = vpop.permute.xlu0 %462  ;;  %v461_v34 = vpop.permute.xlu2 %460  ;;  %v653_v21 = vsel %vm1484_vm7, %v641_v10, 0.0  ;;  %v340_v10 = vsel %vm1456_vm3, %v328_v16, 0.0 }
 0x150   : > { %v474_v60 = vsel %vm470_vm5, %v461_v34, %v463_v51  ;;  %v473_v11 = vsel %vm470_vm5, %v1379_v54, %v461_v34  ;;  %v364_v54 = vmul.f32 %v1323_v32, %v340_v10 }
 0x151   : > { %v518_v50 = vadd.f32 %v512_v20, %v446_v28  ;;  %v519_v31 = vadd.f32 %v513_v40, %v447_v47  ;;  %v485_v30 = vsel %vm1484_vm7, %v473_v11, 0.0  ;;  %v486_v35 = vsel %vm1533_vm10, %v474_v60, 0.0 }
 0x152   : > { %v629_v55 = vpop.permute.xlu1 %628  ;;  %v510_v47 = vmul.f32 %v1403_v58, %v485_v30 }
 0x153   : > { %v586_v0 = vadd.f32 %v580_v48, %v518_v50  ;;  %v587_v62 = vadd.f32 %v581_v49, %v519_v31 }
 0x155   : > { %v1590_v38 = vadd.f32 %v611_v27, %v586_v0  ;;  %v1592_v57 = vadd.f32 %v612_v61, %v587_v62 }
 0x157   : > { %v531_v5 = vpop.permute.xlu0 %530  ;;  %v529_v8 = vpop.permute.xlu2 %528 }
 0x158   : > { %v542_v19 = vsel %vm538_vm2, %v529_v8, %v531_v5  ;;  %v541_v7 = vsel %vm538_vm2, %v1425_v2, %v529_v8  ;;  %v610_v5 = vmul.f32 %v1433_v3, %v1356_v45 }
 0x159   : > { %v554_v59 = vsel %vm1512_vm9, %v542_v19, 0.0 }
 0x15a   : > { %v635_v18 = vpop.permute.xlu1 %634  ;;  %v579_v31 = vmul.f32 %v1417_v63, %v554_v59 }
 0x15f   : > { %v422_v24 = vpop.permute.xlu0 %421  ;;  %v631_v26 = vpop.permute.xlu2 %630 }
 0x160   : > { %v643_v17 = vsel %vm640_vm4, %v629_v55, %v631_v26 }
 0x162   : > { %v666_v22 = vpop.permute.xlu1 %665 }
 0x163   : > { %v678_v36 = vmul.f32 %v666_v22, %v653_v21  ;;  %v679_v56 = vmul.f32 %v666_v22, %v654_v12 }
 0x165   : > { %v684_v15 = vadd.f32 %v678_v36, %v1526_v14  ;;  %v685_v46 = vadd.f32 %v679_v56, %v614_v9  ;;  %v365_v14 = vmul.f32 %v1323_v32, %v341_v23  ;;  %v553_v9 = vsel %vm1456_vm3, %v541_v7, 0.0 }
 0x166   : > { %v511_v32 = vmul.f32 %v1403_v58, %v486_v35  ;;  %v578_v50 = vmul.f32 %v1417_v63, %v553_v9  ;;  %v609_v58 = vmul.f32 %v1433_v3, %v1345_v42  ;;  %v655_v63 = vsel %vm1484_vm7, %v643_v17, 0.0 }
 0x167   : > { %v633_v33 = vpop.permute.xlu0 %632  ;;  %v420_v52 = vpop.permute.xlu2 %419 }
 0x168   : > { %v644_v2 = vsel %vm640_vm4, %v631_v26, %v633_v33  ;;  %v432_v40 = vsel %vm429_vm8, %v1504_v53, %v420_v52  ;;  %v433_v28 = vsel %vm429_vm8, %v420_v52, %v422_v24 }
 0x169   : > { %v444_v48 = vadd.f32 %v432_v40, %v364_v54  ;;  %v445_v49 = vadd.f32 %v433_v28, %v365_v14  ;;  %v656_v8 = vsel %vm1533_vm10, %v644_v2, 0.0 }
 0x16a   : > { %v691_v20 = vpop.permute.xlu1 %690 }
 0x16b   : > { %v516_v51 = vadd.f32 %v510_v47, %v444_v48  ;;  %v517_v34 = vadd.f32 %v511_v32, %v445_v49 }
 0x16d   : > { %v584_v55 = vadd.f32 %v578_v50, %v516_v51  ;;  %v585_v60 = vadd.f32 %v579_v31, %v517_v34 }
 0x16f   : > { %v639_v27 = vpop.permute.xlu0 %638  ;;  %v637_v61 = vpop.permute.xlu2 %636  ;;  %v615_v26 = vadd.f32 %v609_v58, %v584_v55  ;;  %v616_v21 = vadd.f32 %v610_v5, %v585_v60 }
 0x170   : > { %v645_v53 = vsel %vm640_vm4, %v635_v18, %v637_v61  ;;  %v646_v62 = vsel %vm640_vm4, %v637_v61, %v639_v27 }
 0x171   : > { %v657_v24 = vsel %vm1484_vm7, %v645_v53, 0.0  ;;  %v658_v18 = vsel %vm1533_vm10, %v646_v62, 0.0 }
 0x172   : > { %v697_v0 = vpop.permute.xlu1 %696 }
 0x177   : > { %v676_v19 = vpop.permute.xlu0 %675  ;;  %v671_v12 = vpop.permute.xlu2 %670 }
 0x178   : > { %v682_v16 = vmul.f32 %v676_v19, %v657_v24  ;;  %v683_v36 = vmul.f32 %v676_v19, %v658_v18  ;;  %v680_v3 = vmul.f32 %v671_v12, %v655_v63  ;;  %v681_v56 = vmul.f32 %v671_v12, %v656_v8 }
 0x17a   : > { %v703_v22 = vpop.permute.xlu1 %702  ;;  %v688_v17 = vadd.f32 %v682_v16, %v1590_v38  ;;  %v689_v11 = vadd.f32 %v683_v36, %v1592_v57  ;;  %v686_v10 = vadd.f32 %v680_v3, %v615_v26  ;;  %v687_v23 = vadd.f32 %v681_v56, %v616_v21 }
 0x17f   : > { %v695_v7 = vpop.permute.xlu0 %694  ;;  %v693_v30 = vpop.permute.xlu2 %692 }
 0x180   : > { %v709_v54 = vsel %vm708_vm11, %v691_v20, %v693_v30  ;;  %v710_v14 = vsel %vm708_vm11, %v693_v30, %v695_v7 }
 0x181   : > { %v721_v9 = vsel %vm1456_vm3, %v709_v54, 0.0  ;;  %v722_v33 = vsel %vm1512_vm9, %v710_v14, 0.0 }
 0x182   : > { %v734_v35 = vpop.permute.xlu1 %733 }
 0x183   : > { %v746_v52 = vmul.f32 %v734_v35, %v721_v9  ;;  %v747_v38 = vmul.f32 %v734_v35, %v722_v33 }
 0x185   : > { %v1654_v59 = vadd.f32 %v747_v38, %v685_v46  ;;  %v1656_v57 = vadd.f32 %v746_v52, %v684_v15 }
 0x187   : > { %v701_v2 = vpop.permute.xlu0 %700  ;;  %v699_v40 = vpop.permute.xlu2 %698 }
 0x188   : > { %v711_v47 = vsel %vm708_vm11, %v697_v0, %v699_v40  ;;  %v712_v20 = vsel %vm708_vm11, %v699_v40, %v701_v2 }
 0x189   : > { %v723_v60 = vsel %vm1456_vm3, %v711_v47, 0.0  ;;  %v724_v27 = vsel %vm1512_vm9, %v712_v20, 0.0 }
 0x18a   : > { %v765_v28 = vpop.permute.xlu1 %764 }
 0x18b   : > { %v777_v32 = vmul.f32 %v765_v28, %v1330_v37  ;;  %v778_v48 = vmul.f32 %v765_v28, %v1339_v39  ;;  %v779_v49 = vmul.f32 %v765_v28, %v1315_v29 }
 0x18d   : > { %799 = vrot.lane.b32.xlu0 %v779_v49, %s1158_s9  ;;  %795 = vrot.lane.b32.xlu1 %v777_v32, %s1158_s9 }
 0x18e   : > { %797 = vrot.lane.b32.xlu2 %v778_v48, %s1158_s9 }
 0x18f   : > { %v707_v15 = vpop.permute.xlu0 %706  ;;  %v705_v46 = vpop.permute.xlu2 %704 }
 0x190   : > { %v713_v50 = vsel %vm708_vm11, %v703_v22, %v705_v46  ;;  %v714_v31 = vsel %vm708_vm11, %v705_v46, %v707_v15 }
 0x191   : > { %v725_v34 = vsel %vm1456_vm3, %v713_v50, 0.0  ;;  %v726_v55 = vsel %vm1512_vm9, %v714_v31, 0.0 }
 0x197   : > { %v744_v51 = vpop.permute.xlu0 %743  ;;  %v739_v61 = vpop.permute.xlu2 %738 }
 0x198   : > { %v750_v0 = vmul.f32 %v744_v51, %v725_v34  ;;  %v751_v53 = vmul.f32 %v744_v51, %v726_v55  ;;  %v748_v62 = vmul.f32 %v739_v61, %v723_v60  ;;  %v749_v58 = vmul.f32 %v739_v61, %v724_v27 }
 0x19a   : > { %v1676_v5 = vadd.f32 %v750_v0, %v688_v17  ;;  %v1678_v63 = vadd.f32 %v751_v53, %v689_v11  ;;  %v754_v8 = vadd.f32 %v748_v62, %v686_v10  ;;  %v755_v19 = vadd.f32 %v749_v58, %v687_v23 }
 0x19f   : > { %v770_v24 = vpop.permute.xlu2 %769  ;;  %v775_v6 = vpop.permute.xlu0 %774 }
 0x1a0   : > { %v780_v18 = vmul.f32 %v770_v24, %v1345_v42  ;;  %v781_v13 = vmul.f32 %v770_v24, %v1356_v45  ;;  %v782_v26 = vmul.f32 %v770_v24, %v1423_v1  ;;  %v783_v21 = vmul.f32 %v775_v6, %v1347_v43 }
 0x1a1   : > { %v784_v12 = vmul.f32 %v775_v6, %v1353_v44  ;;  %v785_v22 = vmul.f32 %v775_v6, %v1435_v4 }
 0x1a2   : > { %801 = vrot.lane.b32.xlu1 %v780_v18, %s1158_s9  ;;  %805 = vrot.lane.b32.xlu0 %v782_v26, %s1158_s9 }
 0x1a3   : > { %803 = vrot.lane.b32.xlu2 %v781_v13, %s1158_s9 }
 0x1aa   : > { %807 = vrot.lane.b32.xlu1 %v783_v21, %s1158_s9  ;;  %832 = vrot.lane.b32.xlu0 %v1330_v37, %s1159_s27  ;;  %v1020_v37 = vld [vmem:[%s1777_s2 + $0xc0] sm:$0xff] }
 0x1ab   : > { %809 = vrot.lane.b32.xlu2 %v784_v12, %s1158_s9 }
 0x1b2   : > { %834 = vrot.lane.b32.xlu1 %v1339_v39, %s1159_s27  ;;  %838 = vrot.lane.b32.xlu0 %v1345_v42, %s1159_s27  ;;  %v1021_v39 = vld [vmem:[%s1777_s2 + $0xc8] sm:$0xff] }
 0x1b3   : > { %836 = vrot.lane.b32.xlu2 %v1315_v29, %s1159_s27  ;;  %v1022_v29 = vld [vmem:[%s1777_s2 + $0xd0] sm:$0xff] }
 0x1ba   : > { %840 = vrot.lane.b32.xlu1 %v1356_v45, %s1159_s27  ;;  %844 = vrot.lane.b32.xlu0 %v1347_v43, %s1159_s27 }
 0x1bb   : > { %842 = vrot.lane.b32.xlu2 %v1423_v1, %s1159_s27 }
 0x1c2   : > { %846 = vrot.lane.b32.xlu1 %v1353_v44, %s1159_s27  ;;  %811 = vrot.lane.b32.xlu0 %v785_v22, %s1158_s9 }
 0x1c3   : > { %848 = vrot.lane.b32.xlu2 %v1435_v4, %s1159_s27 }
 0x1ca   : > { %875 = vperm.xlu1 %1084, %v1020_v37   ;;  %885 = vperm.xlu0 %1083, %v1022_v29  }
 0x1cb   : > { %880 = vperm.xlu2 %1085, %v1021_v39  }
 0x1e8   : > { %v798_v42 = vpop.permute.xlu2 %797 }
 0x1fd   : > { %v804_v43 = vpop.permute.xlu2 %803 }
 0x1ff   : > { %v796_v45 = vpop.permute.xlu1 %795  ;;  %v800_v1 = vpop.permute.xlu0 %799 }
 0x200   : > { %v815_v46 = vsel %vm813_vm12, %v798_v42, %v800_v1  ;;  %v814_v50 = vsel %vm813_vm12, %v796_v45, %v798_v42 }
 0x201   : > { %v827_v61 = vadd.f32 %v815_v46, %v1654_v59  ;;  %v826_v0 = vadd.f32 %v814_v50, %v1656_v57 }
 0x205   : > { %v810_v44 = vpop.permute.xlu2 %809 }
 0x20d   : > { %v837_v4 = vpop.permute.xlu2 %836 }
 0x214   : > { %v802_v16 = vpop.permute.xlu1 %801  ;;  %v806_v36 = vpop.permute.xlu0 %805 }
 0x215   : > { %v843_v3 = vpop.permute.xlu2 %842  ;;  %v817_v7 = vsel %vm813_vm12, %v804_v43, %v806_v36  ;;  %v816_v30 = vsel %vm813_vm12, %v802_v16, %v804_v43 }
 0x216   : > { %v829_v2 = vadd.f32 %v817_v7, %v755_v19  ;;  %v828_v40 = vadd.f32 %v816_v30, %v754_v8 }
 0x21c   : > { %v808_v56 = vpop.permute.xlu1 %807  ;;  %v833_v17 = vpop.permute.xlu0 %832 }
 0x21d   : > { %v849_v11 = vpop.permute.xlu2 %848  ;;  %v818_v60 = vsel %vm813_vm12, %v808_v56, %v810_v44 }
 0x21e   : > { %v830_v59 = vadd.f32 %v818_v60, %v1676_v5 }
 0x224   : > { %v835_v10 = vpop.permute.xlu1 %834  ;;  %v839_v23 = vpop.permute.xlu0 %838 }
 0x225   : > { %v881_v33 = vpop.permute.xlu2 %880  ;;  %v851_v31 = vsel %vm850_vm13, %v833_v17, %v835_v10  ;;  %v852_v51 = vsel %vm850_vm13, %v835_v10, %v837_v4 }
 0x226   : > { %v863_v53 = vsel %vm1484_vm7, %v851_v31, 0.0  ;;  %v864_v58 = vsel %vm1533_vm10, %v852_v51, 0.0 }
 0x22c   : > { %v841_v35 = vpop.permute.xlu1 %840  ;;  %v845_v54 = vpop.permute.xlu0 %844 }
 0x22d   : > { %v853_v14 = vsel %vm850_vm13, %v839_v23, %v841_v35  ;;  %v854_v9 = vsel %vm850_vm13, %v841_v35, %v843_v3 }
 0x22e   : > { %v865_v52 = vsel %vm1484_vm7, %v853_v14, 0.0  ;;  %v866_v38 = vsel %vm1533_vm10, %v854_v9, 0.0 }
 0x22f   : > { %v890_v28 = vmul.f32 %v881_v33, %v865_v52  ;;  %v891_v47 = vmul.f32 %v881_v33, %v866_v38 }
 0x231   : > { %v896_v20 = vadd.f32 %v890_v28, %v828_v40  ;;  %v897_v32 = vadd.f32 %v891_v47, %v829_v2 }
 0x233   : > { %v901_v48 = vpack.c.bf16 %v897_v32, %v896_v20 }
 0x234   : > { %v847_v49 = vpop.permute.xlu1 %846  ;;  %v812_v15 = vpop.permute.xlu0 %811 }
 0x235   : > { %904 = vst [vmem:[%s1238_s4 + $0x8] sm:$0xff] %v901_v48  ;;  %v855_v34 = vsel %vm850_vm13, %v845_v54, %v847_v49  ;;  %v856_v55 = vsel %vm850_vm13, %v847_v49, %v849_v11  ;;  %v819_v27 = vsel %vm813_vm12, %v810_v44, %v812_v15 }
 0x236   : > { %v867_v19 = vsel %vm1484_vm7, %v855_v34, 0.0  ;;  %v868_v24 = vsel %vm1533_vm10, %v856_v55, 0.0  ;;  %v831_v57 = vadd.f32 %v819_v27, %v1678_v63 }
 0x23c   : > { %v876_v62 = vpop.permute.xlu1 %875  ;;  %v886_v8 = vpop.permute.xlu0 %885 }
 0x23d   : > { %v888_v18 = vmul.f32 %v876_v62, %v863_v53  ;;  %v889_v13 = vmul.f32 %v876_v62, %v864_v58  ;;  %v892_v26 = vmul.f32 %v886_v8, %v867_v19  ;;  %v893_v6 = vmul.f32 %v886_v8, %v868_v24 }
 0x23f   : > { %v894_v21 = vadd.f32 %v888_v18, %v826_v0  ;;  %v895_v25 = vadd.f32 %v889_v13, %v827_v61  ;;  %v898_v12 = vadd.f32 %v892_v26, %v830_v59  ;;  %v899_v22 = vadd.f32 %v893_v6, %v831_v57 }
 0x241   : > { %v900_v41 = vpack.c.bf16 %v895_v25, %v894_v21  ;;  %v902_v37 = vpack.c.bf16 %v899_v22, %v898_v12 }
 0x243   : > { %903 = vst [vmem:[%s1238_s4] sm:$0xff] %v900_v41 }
 0x244   : > { %905 = vst [vmem:[%s1238_s4 + $0x10] sm:$0xff] %v902_v37 }
 0x245   : > { %1113 = shalt.err (!%p1110_p4)
}
 0x246   : > { %s1160_s24 = smov 128   ;;  %s1161_s4 = smov 8  }
 0x247   : > { %1032 = dma.vmem_to_hbm [thread:$0]  (%p1220_p5), %s920_s19, 384, %s922_s20, %s907_s25, %s1160_s24, %s1160_s24, %s1161_s4  }
 0x248 PF: > { %p1038_p7 = scmp.ge.s32.totalorder %s1148_s15, 2  ;;  %s936_s6 = sand.u32 1, %s1136_s12  }
 0x249   : > { %s937_s7 = scalar_lea.sflag [#allocation4], %s936_s6 }
 0x24a   : > { %p1035_p8 = pnand %p1038_p7, %p1224_p6 }
 0x24c   : > { %p1036_p9 = pneg %p1035_p8 }
 0x24e   : > { %1131 = dma.done.wait (%p1036_p9), %s937_s7, 384  }
 0x24f   : > { %1133 = vsyncadd (%p1036_p9), %s937_s7, 4294966912  ;;  %p13_p10 = scmp.ge.s32.totalorder %s1207_s18, 4   ;;  %s1789_s12 = smov %s1140_s13 }
 0x250   : > { %s1790_s13 = smov %s1144_s14  ;;  %s1791_s14 = smov %s1218_s21 }
 0x251   : > { %s1792_s15 = smov %s1207_s18  ;;  %15 = sbr.rel (!%p13_p10) target bundleno = 3 (0x3), region = 79 }
 0x256   :  { %943 = vsyncpa [#allocation4], 1 }
 0x257   :  { %945 = vsyncpa [#allocation4 + $0x1], 1 }

</bundles_post_ra>
